<compile_context>
chip_gen: v7x
topology: tpu7x:2x2x1
jax: 0.10.0
libtpu: 0.0.40
codegen_flags: <defaults>
</compile_context>

<pallas_src>
import jax
import jax.numpy as jnp
from jax.experimental import pallas as pl
from jax.experimental.pallas import tpu as pltpu


def _round_up(x, m):
    return (x + m - 1) // m * m


def _vmem_budget_and_limit():
    """Generation-aware VMEM sizing.

    budget: bytes allowed for the double-buffered feature tiles.
    limit:  vmem_limit_bytes handed to the Mosaic compiler.
    v7x (64 MiB physical) -> 32 MiB budget / 48 MiB limit;
    v5e/v6e (128 MiB)     -> 64 MiB budget / 96 MiB limit.
    """
    try:
        cap = int(pltpu.get_tpu_info().vmem_capacity_bytes)
    except Exception:
        cap = 64 * 1024 * 1024  # conservative (v7x-sized) fallback
    return cap // 2, (3 * cap) // 4


def _choose_atom_tile(n_atoms, feature_sizes, dtype, transposed, budget_bytes):
    """Pick tm (atom rows per grid step): grow to fill the VMEM budget."""
    itemsize = jnp.dtype(dtype).itemsize
    if transposed:
        # Feature tile (nf, tm): sublane dim padded to 8 (f32) / 16 (bf16); lanes dense.
        sub = max(1, 32 // (8 * itemsize)) * 8
        per_row = itemsize * sum(_round_up(nf, sub) for nf in feature_sizes)
    else:
        # Feature tile (tm, nf): lane dim padded to 128 (why transposed is preferred
        # for 16/32-wide features).
        per_row = itemsize * sum(_round_up(nf, 128) for nf in feature_sizes)
    tm = (budget_bytes // (2 * per_row)) // 128 * 128   # double-buffered inputs
    tm = max(128, tm)
    # Keep at least two grid steps so dimension_semantics=("parallel",) can use
    # both v7x TensorCores; harmless (~0.35 us) on single-TC v5e/v6e.
    tm = min(tm, max(128, _round_up(pl.cdiv(n_atoms, 2), 128)))
    tm = min(tm, _round_up(n_atoms, 128))
    return tm


def _make_predict_atom_kernel(n_terms, n_target, transposed):
    # Contraction producing out[t, m] = sum_f w[t, f] * x_f[..]:
    #   transposed features x_t: (nf, tm) -> contract lhs dim 1 with rhs dim 0
    #   row-major   features x  : (tm, nf) -> contract lhs dim 1 with rhs dim 1
    dims = (((1,), (0,)), ((), ())) if transposed else (((1,), (1,)), ((), ()))

    def kernel(*refs):
        x_refs = refs[:n_terms]                  # feature tiles (VMEM)
        w_refs = refs[n_terms:2 * n_terms]       # (n_target, nf_i) weights (VMEM)
        b_ref = refs[2 * n_terms]                # (n_target,) summed bias (SMEM)
        o_ref = refs[2 * n_terms + 1]            # (n_target, tm) lane-dense output

        acc = None
        for x_ref, w_ref in zip(x_refs, w_refs):
            part = jax.lax.dot_general(
                w_ref[...], x_ref[...],
                dimension_numbers=dims,
                preferred_element_type=jnp.float32,   # f32 accumulation on the MXU
            )
            acc = part if acc is None else acc + part

        # Bias is per-target scalar(s) read from SMEM; n_target is small & static.
        if n_target == 1:
            o_ref[...] = (acc + b_ref[0]).astype(o_ref.dtype)
        else:
            for t in range(n_target):
                o_ref[t, :] = (acc[t, :] + b_ref[t]).astype(o_ref.dtype)

    return kernel


def predict_atom(all_features, weights, biases, *, features_transposed=False,
                 interpret=False):
    """Pallas implementation of PredictAtom.forward.

    all_features: list of feature arrays, one per term:
        features_transposed=False -> [n_atoms, nf_i]  (PyTorch layout)
        features_transposed=True  -> [nf_i, n_atoms]  (lane-dense; preferred)
    weights: list of [n_target, nf_i] arrays (torch.nn.Linear weight layout)
    biases:  list of ([n_target] array or None), one per layer
    Returns [n_atoms, n_target] float32.
    """
    n_terms = len(all_features)
    assert len(weights) == n_terms and len(biases) == n_terms
    atom_axis = 1 if features_transposed else 0
    n_atoms = int(all_features[0].shape[atom_axis])
    n_target = int(weights[0].shape[0])
    feature_sizes = tuple(int(w.shape[1]) for w in weights)
    f_total = sum(feature_sizes)

    x_dtype = all_features[0].dtype
    # Weights are tiny; cast them to the feature dtype so the MXU sees one dtype.
    weights = [w.astype(x_dtype) for w in weights]

    # Summing all present biases once is mathematically identical to adding each
    # layer's bias separately.
    b_sum = jnp.zeros((n_target,), jnp.float32)
    for b in biases:
        if b is not None:
            b_sum = b_sum + b.astype(jnp.float32).reshape(n_target)

    budget_bytes, vmem_limit = _vmem_budget_and_limit()
    tm = _choose_atom_tile(n_atoms, feature_sizes, x_dtype,
                           features_transposed, budget_bytes)
    grid = (pl.cdiv(n_atoms, tm),)
    # NOTE: the last grid step may read padding rows past n_atoms; their results
    # only land in output lanes that Pallas drops on writeback.  This stays safe
    # as long as the padded [n_target, n_atoms] buffer is never consumed directly
    # and no reduction grid axis is added later.

    if features_transposed:
        feat_specs = [pl.BlockSpec((nf, tm), lambda i: (0, i)) for nf in feature_sizes]
    else:
        feat_specs = [pl.BlockSpec((tm, nf), lambda i: (i, 0)) for nf in feature_sizes]
    in_specs = (
        feat_specs
        + [pl.BlockSpec((n_target, nf), lambda i: (0, 0)) for nf in feature_sizes]
        + [pl.BlockSpec(memory_space=pltpu.MemorySpace.SMEM)]
    )
    out_spec = pl.BlockSpec((n_target, tm), lambda i: (0, i))

    itemsize = jnp.dtype(x_dtype).itemsize
    cost = pl.CostEstimate(
        flops=2 * n_atoms * f_total * n_target,
        transcendentals=0,
        bytes_accessed=(itemsize * (n_atoms * f_total + n_target * f_total)
                        + 4 * (n_atoms * n_target + n_target)),
    )

    out_t = pl.pallas_call(
        _make_predict_atom_kernel(n_terms, n_target, features_transposed),
        out_shape=jax.ShapeDtypeStruct((n_target, n_atoms), jnp.float32),
        grid_spec=pltpu.PrefetchScalarGridSpec(
            num_scalar_prefetch=0,
            grid=grid,
            in_specs=in_specs,
            out_specs=out_spec,
        ),
        compiler_params=pltpu.CompilerParams(
            dimension_semantics=("parallel",),
            vmem_limit_bytes=vmem_limit,
        ),
        cost_estimate=cost,
        interpret=interpret,
    )(*all_features, *weights, b_sum)

    # [n_target, n_atoms] -> [n_atoms, n_target]; tiny, negligible cost.
    return out_t.T


def init_params(key, feature_sizes, n_target, first_is_interacting=False):
    """Deterministic synthetic parameters matching torch.nn.Linear shapes."""
    has_bias = (first_is_interacting, *(True for _ in range(len(feature_sizes) - 1)))
    weights, biases = [], []
    for nf, bias in zip(feature_sizes, has_bias):
        key, kw, kb = jax.random.split(key, 3)
        bound = 1.0 / jnp.sqrt(nf)
        w = jax.random.uniform(kw, (n_target, nf), jnp.float32, -bound, bound)
        b = (jax.random.uniform(kb, (n_target,), jnp.float32, -bound, bound)
             if bias else None)
        weights.append(w)
        biases.append(b)
    return weights, biases


def reference(all_features, weights, biases):
    """Pure-JAX reference, features in the module's native [n_atoms, nf] layout."""
    out = 0.0
    for x, w, b in zip(all_features, weights, biases):
        y = jnp.dot(x, w.T, precision=jax.lax.Precision.HIGHEST)
        if b is not None:
            y = y + b
        out = out + y
    return out


if __name__ == "__main__":
    key = jax.random.PRNGKey(0)

    feature_sizes = (16, 32, 32)   # HIP-NN: input block + interaction blocks
    n_target = 1
    n_atoms = 1024                 # 2 grid steps -> both v7x TensorCores get work

    keys = jax.random.split(key, len(feature_sizes) + 1)
    weights, biases = init_params(keys[0], feature_sizes, n_target,
                                  first_is_interacting=False)

    # Preferred production path: the producer hands the kernel lane-dense
    # (transposed, [nf, n_atoms]) bf16 features -- created directly in that
    # layout/dtype, so no extra HBM pass is spent transposing or casting.
    feats_t_bf16 = [
        jax.random.normal(keys[i + 1], (nf, n_atoms), jnp.float32).astype(jnp.bfloat16)
        for i, nf in enumerate(feature_sizes)
    ]
    out_fast = jax.block_until_ready(
        predict_atom(feats_t_bf16, weights, biases, features_transposed=True))

    # Reference on the exact same (bf16-rounded) values, all in f32.
    feats_rows_f32 = [x.T.astype(jnp.float32) for x in feats_t_bf16]
    weights_bf16_f32 = [w.astype(jnp.bfloat16).astype(jnp.float32) for w in weights]
    ref_fast = reference(feats_rows_f32, weights_bf16_f32, biases)
    assert out_fast.shape == (n_atoms, n_target)
    assert jnp.allclose(out_fast, ref_fast, atol=1e-3, rtol=1e-3), \
        "bf16 lane-dense path mismatch vs reference"

    # Compatibility path: the module's native [n_atoms, nf] f32 layout.
    # (Looser tolerance: in-kernel f32 dot uses default MXU precision while the
    #  reference uses Precision.HIGHEST.)
    out_compat = jax.block_until_ready(
        predict_atom(feats_rows_f32, weights, biases, features_transposed=False))
    ref_compat = reference(feats_rows_f32, weights, biases)
    assert out_compat.shape == (n_atoms, n_target)
    assert jnp.allclose(out_compat, ref_compat, atol=1e-2, rtol=1e-2), \
        "f32 row-major path mismatch vs reference"

    print("KERNEL_OK")
</pallas_src>

<mosaic_0001>
module attributes {stable_mosaic.version = 11 : i64} {
  func.func @kernel(%arg0: i32, %arg1: memref<16x512xbf16, #tpu.memory_space<vmem>>, %arg2: memref<32x512xbf16, #tpu.memory_space<vmem>>, %arg3: memref<32x512xbf16, #tpu.memory_space<vmem>>, %arg4: memref<1x16xbf16, #tpu.memory_space<vmem>>, %arg5: memref<1x32xbf16, #tpu.memory_space<vmem>>, %arg6: memref<1x32xbf16, #tpu.memory_space<vmem>>, %arg7: memref<1xf32, #tpu.memory_space<smem>>, %arg8: memref<1x512xf32, #tpu.memory_space<vmem>>) attributes {dimension_semantics = [#tpu.dimension_semantics<parallel>], iteration_bounds = array<i64: 2>, scalar_prefetch = 0 : i64, scratch_operands = 0 : i64, tpu.core_type = #tpu.core_type<tc>, window_params = [{transform_indices = @transform_0, window_bounds = array<i64: 16, 512>}, {transform_indices = @transform_1, window_bounds = array<i64: 32, 512>}, {transform_indices = @transform_2, window_bounds = array<i64: 32, 512>}, {pipeline_mode = #tpu.pipeline_mode<synchronous>, transform_indices = @transform_3, window_bounds = array<i64: 1, 16>}, {pipeline_mode = #tpu.pipeline_mode<synchronous>, transform_indices = @transform_4, window_bounds = array<i64: 1, 32>}, {pipeline_mode = #tpu.pipeline_mode<synchronous>, transform_indices = @transform_5, window_bounds = array<i64: 1, 32>}, {transform_indices = @transform_6, window_bounds = array<i64: 1>}, {transform_indices = @transform_7, window_bounds = array<i64: 1, 512>}]} {
    %c0 = arith.constant 0 : index
    %c0_0 = arith.constant 0 : index
    %0 = vector.load %arg4[%c0, %c0_0] : memref<1x16xbf16, #tpu.memory_space<vmem>>, vector<1x16xbf16>
    %c0_1 = arith.constant 0 : index
    %c0_2 = arith.constant 0 : index
    %1 = vector.load %arg1[%c0_1, %c0_2] : memref<16x512xbf16, #tpu.memory_space<vmem>>, vector<16x512xbf16>
    %cst = arith.constant dense<0.000000e+00> : vector<1x512xf32>
    %2 = tpu.matmul %0, %1, %cst {dimension_numbers = #tpu.dot_dimension_numbers<[1], [0], [0], [1], [0, 0, 1, 1], [], []>} : vector<1x16xbf16>, vector<16x512xbf16>, vector<1x512xf32> -> vector<1x512xf32>
    %c0_3 = arith.constant 0 : index
    %c0_4 = arith.constant 0 : index
    %3 = vector.load %arg5[%c0_3, %c0_4] : memref<1x32xbf16, #tpu.memory_space<vmem>>, vector<1x32xbf16>
    %c0_5 = arith.constant 0 : index
    %c0_6 = arith.constant 0 : index
    %4 = vector.load %arg2[%c0_5, %c0_6] : memref<32x512xbf16, #tpu.memory_space<vmem>>, vector<32x512xbf16>
    %cst_7 = arith.constant dense<0.000000e+00> : vector<1x512xf32>
    %5 = tpu.matmul %3, %4, %cst_7 {dimension_numbers = #tpu.dot_dimension_numbers<[1], [0], [0], [1], [0, 0, 1, 1], [], []>} : vector<1x32xbf16>, vector<32x512xbf16>, vector<1x512xf32> -> vector<1x512xf32>
    %6 = arith.addf %2, %5 : vector<1x512xf32>
    %c0_8 = arith.constant 0 : index
    %c0_9 = arith.constant 0 : index
    %7 = vector.load %arg6[%c0_8, %c0_9] : memref<1x32xbf16, #tpu.memory_space<vmem>>, vector<1x32xbf16>
    %c0_10 = arith.constant 0 : index
    %c0_11 = arith.constant 0 : index
    %8 = vector.load %arg3[%c0_10, %c0_11] : memref<32x512xbf16, #tpu.memory_space<vmem>>, vector<32x512xbf16>
    %cst_12 = arith.constant dense<0.000000e+00> : vector<1x512xf32>
    %9 = tpu.matmul %7, %8, %cst_12 {dimension_numbers = #tpu.dot_dimension_numbers<[1], [0], [0], [1], [0, 0, 1, 1], [], []>} : vector<1x32xbf16>, vector<32x512xbf16>, vector<1x512xf32> -> vector<1x512xf32>
    %10 = arith.addf %6, %9 : vector<1x512xf32>
    %c0_13 = arith.constant 0 : index
    %11 = memref.load %arg7[%c0_13] : memref<1xf32, #tpu.memory_space<smem>>
    %12 = vector.broadcast %11 : f32 to vector<1x512xf32>
    %13 = arith.addf %10, %12 : vector<1x512xf32>
    %c0_14 = arith.constant 0 : index
    %c0_15 = arith.constant 0 : index
    %14 = vector.load %arg8[%c0_14, %c0_15] : memref<1x512xf32, #tpu.memory_space<vmem>>, vector<1x512xf32>
    tpu.vector_store %arg8[%c0_14, %c0_15], %13 {strides = array<i32>} : memref<1x512xf32, #tpu.memory_space<vmem>>, vector<1x512xf32>,
    return
  }
  func.func @transform_0(%arg0: i32) -> (i32, i32) {
    %c0_i32 = arith.constant 0 : i32
    %c0_i32_0 = arith.constant 0 : i32
    return %c0_i32, %arg0 : i32, i32
  }
  func.func @transform_1(%arg0: i32) -> (i32, i32) {
    %c0_i32 = arith.constant 0 : i32
    %c0_i32_0 = arith.constant 0 : i32
    return %c0_i32, %arg0 : i32, i32
  }
  func.func @transform_2(%arg0: i32) -> (i32, i32) {
    %c0_i32 = arith.constant 0 : i32
    %c0_i32_0 = arith.constant 0 : i32
    return %c0_i32, %arg0 : i32, i32
  }
  func.func @transform_3(%arg0: i32) -> (i32, i32) {
    %c0_i32 = arith.constant 0 : i32
    %c0_i32_0 = arith.constant 0 : i32
    %c0_i32_1 = arith.constant 0 : i32
    return %c0_i32, %c0_i32_0 : i32, i32
  }
  func.func @transform_4(%arg0: i32) -> (i32, i32) {
    %c0_i32 = arith.constant 0 : i32
    %c0_i32_0 = arith.constant 0 : i32
    %c0_i32_1 = arith.constant 0 : i32
    return %c0_i32, %c0_i32_0 : i32, i32
  }
  func.func @transform_5(%arg0: i32) -> (i32, i32) {
    %c0_i32 = arith.constant 0 : i32
    %c0_i32_0 = arith.constant 0 : i32
    %c0_i32_1 = arith.constant 0 : i32
    return %c0_i32, %c0_i32_0 : i32, i32
  }
  func.func @transform_6(%arg0: i32) -> i32 {
    %c0_i32 = arith.constant 0 : i32
    %c0_i32_0 = arith.constant 0 : i32
    return %c0_i32 : i32
  }
  func.func @transform_7(%arg0: i32) -> (i32, i32) {
    %c0_i32 = arith.constant 0 : i32
    %c0_i32_0 = arith.constant 0 : i32
    return %c0_i32, %arg0 : i32, i32
  }
}

</mosaic_0001>

<bundles_post_ra>
// kernel: tpu_custom_call.1
= control target key start
LH: loop header
LB: loop body
LE: loop exit
PB: predicated region body
PF: predicated region fallthrough
CT: control target
= control target key end

     0   :  { %s1565_s0 = inlined_call_operand.hbm [shape: bf16[16,1024], index: 0, kind: input, shape index: {}]   ;;  %s1566_s1 = inlined_call_operand.hbm [shape: bf16[32,1024], index: 1, kind: input, shape index: {}]   ;;  %s1567_s2 = inlined_call_operand.hbm [shape: bf16[32,1024], index: 2, kind: input, shape index: {}]   ;;  %s1568_s3 = inlined_call_operand.vmem [shape: bf16[1,16], index: 3, kind: input, shape index: {}]   ;;  %s1569_s4 = inlined_call_operand.vmem [shape: bf16[1,32], index: 4, kind: input, shape index: {}]   ;;  %s1570_s5 = inlined_call_operand.vmem [shape: bf16[1,32], index: 5, kind: input, shape index: {}]   ;;  %s1571_s6 = inlined_call_operand.<no memory space> [shape: f32[1], index: 6, kind: input, shape index: {}]   ;;  %s1572_s7 = inlined_call_operand.hbm [shape: f32[1,1024], index: 7, kind: output, shape index: {}]  }
   0x1   :  { %1586 = sst [smem:[#allocation18_spill]] %s1566_s1 }
   0x2   :  { %12 = sst [smem:[#allocation2]] %s1571_s6 }
   0x3   :  { %13 = vsyncpa [#allocation4], 0 }
   0x4   :  { %15 = vsyncpa [#allocation4 + $0x1], 0 }
   0x5   :  { %16 = vsyncpa [#allocation7], 0 }
   0x6   :  { %18 = vsyncpa [#allocation7 + $0x1], 0 }
   0x7   :  { %19 = vsyncpa [#allocation5], 0 }
   0x8   :  { %21 = vsyncpa [#allocation5 + $0x1], 0  ;;  %s1289_s26 = smov 0   ;;  %s1291_s27 = smov 0  }
   0x9   :  { %s1293_s28 = smov 0   ;;  %s1295_s29 = smov 0  }
   0xa LB: > { %1587 = sst [smem:[#allocation13_spill]] %s1231_s28  ;;  %s1310_s6 = sadd.s32 4294967295, %s1235_s29   ;;  %s1235_s29 = sphi %s1295_s29, %s1609_s29   ;;  %s1231_s28 = sphi %s1293_s28, %s1611_s28   ;;  %s1227_s27 = sphi %s1291_s27, %s1613_s27   ;;  %s1223_s26 = sphi %s1289_s26, %s1612_s26  }
   0xb   : > { %1588 = sst [smem:[#allocation14_spill]] %s1235_s29  ;;  %s932_s30 = sadd.s32 4294967294, %s1235_s29  }
   0xc   : > { %s1314_s8 = sadd.s32 1, %s1235_s29   ;;  %s34_s9 = sadd.s32 1, %s1231_s28 }
   0xd   : > { %1589 = sst [smem:[#allocation15_spill]] %s1314_s8  ;;  %s31_s10 = ssub.s32 %s1235_s29, %s1314_s8 }
   0xe   : > { %p41_p0 = scmp.ne.s32.totalorder %s1231_s28, %s1227_s27  ;;  %p32_p1 = scmp.eq.s32.totalorder %s31_s10, 0 }
   0xf   : > { %p42_p2 = scmp.eq.s32.totalorder %s1235_s29, 0  ;;  %p47_p3 = scmp.ne.s32.totalorder %s1227_s27, %s1223_s26 }
  0x10   : > { %p48_p4 = scmp.eq.s32.totalorder %s1310_s6, 0  ;;  %p207_p7 = scmp.eq.s32.totalorder %s1310_s6, 1 }
  0x11   : > { %s1326_s11 = scalar_select %p32_p1, %s1231_s28, %s34_s9  }
  0x12   : > { %p43_p5 = por %p42_p2, %p41_p0  ;;  %p1328_p6 = por %p48_p4, %p47_p3 }
  0x13   : > { %1590 = sst [smem:[#allocation16_spill]] %s1326_s11  ;;  %p213_p8 = scmp.eq.s32.totalorder %s932_s30, 1 }
  0x14   : > { %s1591_s12 = scalar_select %p1328_p6, 1, 0 }
  0x15   : > { %p1006_p10 = scmp.lt.s32.totalorder %s1235_s29, 2  ;;  %p1335_p11 = por %p207_p7, %p41_p0 }
  0x16   : > { %p1339_p12 = por %p213_p8, %p47_p3  ;;  %s1344_s15 = sand.u32 1, %s1231_s28  }
  0x17   : > { %s1592_s13 = scalar_select %p1335_p11, 1, 0 }
  0x18   : > { %s1593_s14 = scalar_select %p1339_p12, 1, 0 }
  0x19   : > { %s1347_s16 = sshll.u32 %s1235_s29, 8  ;;  %p1349_p13 = pnand %p1006_p10, %p43_p5 }
  0x1a   : > { %1594 = sst [smem:[#allocation17_spill]] %s1593_s14  ;;  %s266_s18 = sand.u32 1, %s1235_s29  }
  0x1b   : > { %s938_s19 = sshll.u32 %s1344_s15, 6  ;;  %s1596_s1 = sld [smem:[#allocation18_spill]] }
  0x1c   : > { %s270_s23 = scalar_lea.vmem [#allocation6], %s938_s19  ;;  %s1363_s25 = scalar_lea.vmem [#allocation8], %s938_s19 }
  0x1d   : > { %s277_s24 = sshll.u32 %s270_s23, 4  ;;  %s298_s30 = sshll.u32 %s1363_s25, 4  ;;  %s1361_s24 = int_to_ptr.vmem [resolvable:$true] %s277_s24  ;;  %s1401_s30 = int_to_ptr.vmem [resolvable:$true] %s298_s30 }
  0x1e   : > { %s1366_s9 = scalar_lea.sflag [#allocation7], %s266_s18  ;;  %p1372_p1 = pneg %p1349_p13 }
  0x21   : > { %s1359_s22 = scalar_lea.hbm %s1596_s1, %s1347_s16  ;;  %s1080_s19 = scalar_lea.hbm %s1596_s1, 2048 }
  0x22   : > { %s1075_s10 = scalar_lea.hbm %s1359_s22, 1024  ;;  %p1081_p4 = scmp.lt.u32.totalorder %s1359_s22, %s1596_s1 }
  0x23   : > { %p1076_p0 = scmp.ne.s32.totalorder %s1359_s22, %s1075_s10  ;;  %p1082_p5 = scmp.lt.u32.totalorder %s1080_s19, %s1075_s10 }
  0x24   : > { %p1084_p8 = scmp.lt.u32.totalorder %s1075_s10, %s1359_s22 }
  0x25   : > { %p1078_p2 = pnand %p1372_p1, %p1076_p0  ;;  %p1083_p7 = por %p1082_p5, %p1081_p4 }
  0x27   : > { %p1079_p3 = pneg %p1078_p2  ;;  %p1085_p10 = por %p1084_p8, %p1083_p7 }
  0x29   : > { %p1086_p9 = pnand %p1085_p10, %p1079_p3 }
  0x2b   : > { %1089 = shalt.err (!%p1086_p9)
}
  0x2c   : > { %s1090_s18 = scalar_lea.vmem %s1361_s24, 1024  ;;  %s1237_s21 = smov [#allocation6]  }
  0x2d   : > { %p1091_p0 = scmp.ne.s32.totalorder %s1361_s24, %s1090_s18  ;;  %s1095_s23 = sshll.u32 %s1237_s21, 4  ;;  %s1096_s23 = int_to_ptr.vmem [resolvable:$false] %s1095_s23 }
  0x2e   : > { %s1097_s28 = scalar_lea.vmem %s1096_s23, 2048  ;;  %p1098_p11 = scmp.lt.s32.totalorder %s1361_s24, %s1096_s23 }
  0x2f   : > { %p1093_p2 = pnand %p1091_p0, %p1372_p1  ;;  %p1099_p6 = scmp.lt.s32.totalorder %s1097_s28, %s1090_s18 }
  0x31   : > { %p1094_p12 = pneg %p1093_p2  ;;  %p1100_p4 = por %p1099_p6, %p1098_p11 }
  0x33   : > { %p1101_p5 = pnand %p1100_p4, %p1094_p12 }
  0x35   : > { %1104 = shalt.err (!%p1101_p5)
}
  0x36   : > { %s1576_s11 = smov 512   ;;  %s1578_s10 = smov 256  }
  0x37   : > { %s1580_s19 = smov 16   ;;  %p944_p6 = scmp.ge.s32.totalorder %s1235_s29, 1 }
  0x38   : > { %998 = dma.hbm_to_vmem [thread:$0]  (!%p1349_p13), %s1359_s22, 1024, %s1361_s24, %s1366_s9, %s1576_s11, %s1578_s10, %s1580_s19  }
  0x39   : > { %p306_p9 = scmp.lt.s32.totalorder %s1235_s29, 3  ;;  %s935_s18 = sshll.u32 %s1344_s15, 5 }
  0x3a   : > { %s1410_s28 = scalar_lea.hbm %s1565_s0, %s1347_s16  ;;  %s249_s22 = scalar_lea.vmem [#allocation3], %s935_s18 }
  0x3b   : > { %p1412_p11 = pnand %p944_p6, %p306_p9  ;;  %s256_s24 = sshll.u32 %s249_s22, 4  ;;  %s1422_s24 = int_to_ptr.vmem [resolvable:$true] %s256_s24 }
  0x3c   : > { %s1420_s10 = scalar_lea.hbm %s1567_s2, %s1347_s16  ;;  %s246_s21 = scalar_lea.sflag [#allocation4], %s1344_s15 }
  0x3d   : > { %s1598_s1 = scalar_select %p1412_p11, 1, 0 }
  0x3e   : > { %s1105_s23 = scalar_lea.hbm %s1410_s28, 512  ;;  %s1110_s29 = scalar_lea.hbm %s1565_s0, 1024 }
  0x3f   : > { %p1106_p12 = scmp.ne.s32.totalorder %s1410_s28, %s1105_s23  ;;  %p1111_p8 = scmp.lt.u32.totalorder %s1410_s28, %s1565_s0 }
  0x40   : > { %p1112_p10 = scmp.lt.u32.totalorder %s1110_s29, %s1105_s23  ;;  %p1114_p2 = scmp.lt.u32.totalorder %s1105_s23, %s1410_s28 }
  0x41   : > { %p1108_p3 = pnand %p1106_p12, %p1372_p1 }
  0x42   : > { %p1113_p0 = por %p1112_p10, %p1111_p8 }
  0x43   : > { %p1109_p7 = pneg %p1108_p3 }
  0x44   : > { %p1115_p4 = por %p1114_p2, %p1113_p0 }
  0x46   : > { %p1116_p5 = pnand %p1115_p4, %p1109_p7 }
  0x48   : > { %1119 = shalt.err (!%p1116_p5)
}
  0x49   : > { %s1120_s16 = scalar_lea.vmem %s1422_s24, 512  ;;  %s1241_s8 = smov [#allocation3]  }
  0x4a   : > { %p1121_p6 = scmp.ne.s32.totalorder %s1422_s24, %s1120_s16  ;;  %s1125_s11 = sshll.u32 %s1241_s8, 4  ;;  %s1126_s11 = int_to_ptr.vmem [resolvable:$false] %s1125_s11 }
  0x4b   : > { %s1127_s14 = scalar_lea.vmem %s1126_s11, 1024  ;;  %p1128_p3 = scmp.lt.s32.totalorder %s1422_s24, %s1126_s11 }
  0x4c   : > { %p1123_p9 = pnand %p1121_p6, %p1372_p1  ;;  %p1129_p11 = scmp.lt.s32.totalorder %s1127_s14, %s1120_s16 }
  0x4e   : > { %p1124_p12 = pneg %p1123_p9  ;;  %p1130_p8 = por %p1129_p11, %p1128_p3 }
  0x50   : > { %p1131_p10 = pnand %p1130_p8, %p1124_p12 }
  0x52   : > { %1134 = shalt.err (!%p1131_p10)
}
  0x53   : > { %s1599_s29 = smov 16   ;;  %s1600_s19 = smov 256  }
  0x54   : > { %s1601_s22 = smov 512   ;;  %s1135_s25 = scalar_lea.hbm %s1420_s10, 1024 }
  0x55   : > { %995 = dma.hbm_to_vmem [thread:$0]  (!%p1349_p13), %s1410_s28, 512, %s1422_s24, %s246_s21, %s1601_s22, %s1600_s19, %s1599_s29  }
  0x56   : > { %p1136_p7 = scmp.ne.s32.totalorder %s1420_s10, %s1135_s25  ;;  %s1140_s16 = scalar_lea.hbm %s1567_s2, 2048 }
  0x57   : > { %p1141_p2 = scmp.lt.u32.totalorder %s1420_s10, %s1567_s2  ;;  %p1142_p4 = scmp.lt.u32.totalorder %s1140_s16, %s1135_s25 }
  0x58   : > { %p1138_p11 = pnand %p1136_p7, %p1372_p1  ;;  %p1144_p6 = scmp.lt.u32.totalorder %s1135_s25, %s1420_s10 }
  0x59   : > { %p1143_p5 = por %p1142_p4, %p1141_p2 }
  0x5a   : > { %p1139_p0 = pneg %p1138_p11 }
  0x5b   : > { %p1145_p9 = por %p1144_p6, %p1143_p5 }
  0x5d   : > { %p1146_p12 = pnand %p1145_p9, %p1139_p0 }
  0x5f   : > { %1149 = shalt.err (!%p1146_p12)
}
  0x60   : > { %s1150_s15 = scalar_lea.vmem %s1401_s30, 1024  ;;  %s1242_s28 = smov [#allocation8]  }
  0x61   : > { %p1151_p3 = scmp.ne.s32.totalorder %s1401_s30, %s1150_s15  ;;  %s1155_s24 = sshll.u32 %s1242_s28, 4  ;;  %s1156_s24 = int_to_ptr.vmem [resolvable:$false] %s1155_s24 }
  0x62   : > { %s1157_s21 = scalar_lea.vmem %s1156_s24, 2048  ;;  %p1158_p7 = scmp.lt.s32.totalorder %s1401_s30, %s1156_s24 }
  0x63   : > { %p1153_p8 = pnand %p1151_p3, %p1372_p1  ;;  %p1159_p11 = scmp.lt.s32.totalorder %s1157_s21, %s1150_s15 }
  0x65   : > { %p1154_p10 = pneg %p1153_p8  ;;  %p1160_p2 = por %p1159_p11, %p1158_p7 }
  0x67   : > { %p1161_p4 = pnand %p1160_p2, %p1154_p10 }
  0x69   : > { %1164 = shalt.err (!%p1161_p4)
}
  0x6a   : > { %1001 = dma.hbm_to_vmem [thread:$0]  (!%p1349_p13), %s1420_s10, 1024, %s1401_s30, %s1366_s9, %s1601_s22, %s1600_s19, %s1599_s29  }
  0x6b   : > { %p1602_p1 = scmp.ne.s32.totalorder %s1598_s1, 0 }
  0x6c   : > { %s1479_s20 = sand.u32 (!%p1602_p1), 1, %s1227_s27   ;;  %p1603_p0 = scmp.ne.s32.totalorder (!%p1602_p1), %s1591_s12, 0 }
  0x6d   : > { %310 = sbr.rel (%p1602_p1) target bundleno = 385 (0x181), region = 48  ;;  %s945_s14 = sshll.u32 (!%p1602_p1), %s1479_s20, 5 }
  0x6e   : > { %s313_s25 = scalar_lea.sflag (!%p1602_p1), [#allocation4], %s1479_s20  ;;  %s1483_s23 = scalar_lea.vmem (!%p1602_p1), [#allocation3], %s945_s14 }
  0x74   : > { %1210 = dma.done.wait (%p1603_p0), %s313_s25, 512  }
  0x75   : > { %1212 = vsyncadd (%p1603_p0), %s313_s25, 4294966784  ;;  %s321_s1 = sand.u32 1, %s1310_s6   ;;  %s946_s17 = sshll.u32 %s1479_s20, 6 }
  0x76   : > { %s322_s30 = scalar_lea.sflag [#allocation7], %s321_s1  ;;  %s325_s9 = scalar_lea.vmem [#allocation6], %s946_s17 }
  0x77   : > { %1214 = dma.done.wait (%p1603_p0), %s322_s30, 2048  }
  0x78   : > { %1216 = vsyncadd (%p1603_p0), %s322_s30, 4294965248  ;;  %v1243_v0 = vmov 0   ;;  %v1045_v1 = vld [vmem:[%s325_s9 + $0x4] ss:$16 sps:$4 sm:$0xff]   ;;  %v1047_v2 = vld [vmem:[%s325_s9 + $0xc] ss:$16 sps:$4 sm:$0xff]   ;;  %v779_v46 = vlaneseq }
  0x79   : > { %470 = vmatprep.mubr.bf16.mxu0 %v1243_v0  ;;  %511 = vmatprep.mubr.bf16.mxu1 %v1243_v0  ;;  %v1049_v3 = vld [vmem:[%s325_s9] ss:$16 sps:$4 sm:$0xff]   ;;  %v1050_v4 = vld [vmem:[%s325_s9 + $0x8] ss:$16 sps:$4 sm:$0xff]   ;;  %v1051_v5 = vld [vmem:[%s325_s9 + $0x24] ss:$16 sps:$4 sm:$0xff]  }
  0x7a   : > { %438 = vmatprep.subr.bf16.mxu0 %v1045_v1  ;;  %479 = vmatprep.subr.bf16.mxu1 %v1047_v2  ;;  %v1053_v6 = vld [vmem:[%s325_s9 + $0x2c] ss:$16 sps:$4 sm:$0xff]   ;;  %v1055_v7 = vld [vmem:[%s325_s9 + $0x20] ss:$16 sps:$4 sm:$0xff]   ;;  %v1056_v8 = vld [vmem:[%s325_s9 + $0x28] ss:$16 sps:$4 sm:$0xff]  }
  0x7b   : > { %439 = vmatpush1.bf16.msra.mxu0 %v1049_v3  ;;  %480 = vmatpush1.bf16.msra.mxu1 %v1050_v4  ;;  %v385_v9 = vld [vmem:[%s1569_s4] sm:$0x1]  ;;  %v1059_v10 = vld [vmem:[%s1483_s23 + $0x4] ss:$16 sps:$4 sm:$0xff]   ;;  %vm434_vm0 = vcmask 261120   ;;  %s334_s29 = scalar_lea.vmem [#allocation8], %s946_s17 }
  0x7c   : > { %440 = vmatprep.subr.bf16.mxu0 %v1051_v5  ;;  %481 = vmatprep.subr.bf16.mxu1 %v1053_v6  ;;  %v1057_v11 = vld [vmem:[%s1483_s23] ss:$16 sps:$4 sm:$0xff]   ;;  %v1060_v12 = vld [vmem:[%s1483_s23 + $0x8] ss:$16 sps:$4 sm:$0xff]   ;;  %v1062_v13 = vld [vmem:[%s1483_s23 + $0xc] ss:$16 sps:$4 sm:$0xff]  }
  0x7d   : > { %v1065_v14 = vld [vmem:[%s334_s29 + $0x4] ss:$16 sps:$4 sm:$0xff]   ;;  %v1068_v15 = vld [vmem:[%s334_s29 + $0xc] ss:$16 sps:$4 sm:$0xff]   ;;  %vm540_vm1 = vcmask 130048   ;;  %s764_s8 = sld [smem:[#allocation2]] }
  0x7e   : > { %v380_v16 = vld [vmem:[%s1568_s3] sm:$0x1]  ;;  %v1066_v18 = vld [vmem:[%s334_s29 + $0x8] ss:$16 sps:$4 sm:$0xff]   ;;  %v1071_v19 = vld [vmem:[%s334_s29 + $0x24] ss:$16 sps:$4 sm:$0xff]  }
  0x7f   : > { %441 = vmatpush1.bf16.msra.mxu0 %v1055_v7  ;;  %482 = vmatpush1.bf16.msra.mxu1 %v1056_v8  ;;  %v1063_v17 = vld [vmem:[%s334_s29] ss:$16 sps:$4 sm:$0xff]   ;;  %v1074_v20 = vld [vmem:[%s334_s29 + $0x2c] ss:$16 sps:$4 sm:$0xff]   ;;  %v1072_v22 = vld [vmem:[%s334_s29 + $0x28] ss:$16 sps:$4 sm:$0xff]  }
  0x80   : > { %544 = vmatprep.subr.bf16.mxu0 %v1059_v10  ;;  %585 = vmatprep.subr.bf16.mxu1 %v1062_v13  ;;  %v1069_v21 = vld [vmem:[%s334_s29 + $0x20] ss:$16 sps:$4 sm:$0xff]   ;;  %v1244_v44 = vmov 1966171168   ;;  %v780_v51 = vshrl.u32 %v779_v46, 7  ;;  %s948_s11 = sshll.u32 %s1479_s20, 2 }
  0x81   : > { %v626_v23 = vld [vmem:[%s1570_s5] sm:$0x1]  ;;  %v777_v45 = vunpack.c.l.s4 %v1244_v44  ;;  %s983_s15 = sshll.u32 %s1310_s6, 6  ;;  %s374_s28 = scalar_lea.vmem [#allocation9], %s948_s11  ;;  %vm801_vm2 = vcmp.lt.s32.totalorder %v779_v46, 512 }
  0x82   : > { %957 = vmatmul.mubr.msk.bf16.vlgmr.msra.gmra.mrb[0].mxu0 %vm434_vm0, %v385_v9  ;;  %958 = vmatmul.mubr.msk.bf16.vlgmr.msra.gmra.mrb[0].mxu1 %vm434_vm0, %v385_v9  ;;  %s819_s24 = sshll.u32 %s374_s28, 4  ;;  %s1521_s25 = scalar_lea.hbm %s1572_s7, %s983_s15  ;;  %s1523_s24 = int_to_ptr.vmem [resolvable:$true] %s819_s24 }
  0x83   : > { %545 = vmatpush1.bf16.msra.mxu0 %v1057_v11  ;;  %586 = vmatpush1.bf16.msra.mxu1 %v1060_v12  ;;  %v765_v48 = vstv %s764_s8  ;;  %v778_v50 = vunpack.c.0.s8 %v777_v45  ;;  %s805_s23 = scalar_lea.sflag [#allocation5], %s1479_s20  ;;  %s1165_s1 = scalar_lea.vmem %s1523_s24, 64 }
  0x84   : > { %576 = vmatprep.mubr.bf16.mxu0 %v1243_v0  ;;  %617 = vmatprep.mubr.bf16.mxu1 %v1243_v0  ;;  %p1166_p13 = scmp.ne.s32.totalorder %s1523_s24, %s1165_s1  ;;  %p1604_p5 = scmp.ne.s32.totalorder %s1592_s13, 0 }
  0x85   : > { %678 = vmatprep.subr.bf16.mxu0 %v1065_v14  ;;  %719 = vmatprep.subr.bf16.mxu1 %v1068_v15  ;;  %v781_v1 = vsub.s32 %v778_v50, %v780_v51  ;;  %s1245_s6 = smov [#allocation9]  }
  0x86   : > { %p1167_p6 = pnand %p1166_p13, %p1604_p5  ;;  %s1169_s17 = sshll.u32 %s1245_s6, 4  ;;  %s1170_s17 = int_to_ptr.vmem [resolvable:$false] %s1169_s17 }
  0x87   : > { %s1171_s30 = scalar_lea.vmem %s1170_s17, 128  ;;  %p1172_p12 = scmp.lt.s32.totalorder %s1523_s24, %s1170_s17 }
  0x88   : > { %p1168_p9 = pneg %p1167_p6  ;;  %p1173_p3 = scmp.lt.s32.totalorder %s1171_s30, %s1165_s1 }
  0x8a   : > { %963 = vmatmul.mubr.msk.bf16.vlgmr.msra.gmra.mrb[4].mxu0 %vm540_vm1, %v380_v16  ;;  %964 = vmatmul.mubr.msk.bf16.vlgmr.msra.gmra.mrb[4].mxu1 %vm540_vm1, %v380_v16  ;;  %p1174_p8 = por %p1173_p3, %p1172_p12 }
  0x8b   : > { %679 = vmatpush1.bf16.msra.mxu0 %v1063_v17  ;;  %720 = vmatpush1.bf16.msra.mxu1 %v1066_v18 }
  0x8c   : > { %680 = vmatprep.subr.bf16.mxu0 %v1071_v19  ;;  %721 = vmatprep.subr.bf16.mxu1 %v1074_v20  ;;  %p1175_p10 = pnand %p1174_p8, %p1168_p9 }
  0x8d   : > { %710 = vmatprep.mubr.bf16.mxu0 %v1243_v0  ;;  %751 = vmatprep.mubr.bf16.mxu1 %v1243_v0 }
  0x8f   : > { %681 = vmatpush1.bf16.msra.mxu0 %v1069_v21  ;;  %722 = vmatpush1.bf16.msra.mxu1 %v1072_v22 }
  0x92   : > { %973 = vmatmul.mubr.msk.bf16.vlgmr.msra.gmra.mrb[8].mxu0 %vm434_vm0, %v626_v23  ;;  %974 = vmatmul.mubr.msk.bf16.vlgmr.msra.gmra.mrb[8].mxu1 %vm434_vm0, %v626_v23 }
 0x155   : > { %v472_v24 = vpop.f32.mrb[0].mxu0  ;;  %v513_v25 = vpop.f32.mrb[0].mxu1 }
 0x156   : > { %v474_v26 = vpop.f32.mrb[1].mxu0  ;;  %v515_v27 = vpop.f32.mrb[1].mxu1 }
 0x157   : > { %v476_v28 = vpop.f32.mrb[2].mxu0  ;;  %v517_v29 = vpop.f32.mrb[2].mxu1 }
 0x158   : > { %v477_v30 = vpop.f32.mrb[3].mxu0  ;;  %v518_v31 = vpop.f32.mrb[3].mxu1 }
 0x15d   : > { %v578_v32 = vpop.f32.mrb[4].mxu0  ;;  %v619_v33 = vpop.f32.mrb[4].mxu1 }
 0x15e   : > { %v579_v34 = vadd.f32 %v578_v32, %v472_v24  ;;  %v620_v35 = vadd.f32 %v619_v33, %v513_v25  ;;  %v580_v36 = vpop.f32.mrb[5].mxu0  ;;  %v621_v37 = vpop.f32.mrb[5].mxu1 }
 0x15f   : > { %v581_v38 = vadd.f32 %v580_v36, %v474_v26  ;;  %v622_v39 = vadd.f32 %v621_v37, %v515_v27  ;;  %v582_v40 = vpop.f32.mrb[6].mxu0  ;;  %v623_v41 = vpop.f32.mrb[6].mxu1 }
 0x160   : > { %v583_v42 = vpop.f32.mrb[7].mxu0  ;;  %v624_v43 = vpop.f32.mrb[7].mxu1 }
 0x165   : > { %v712_v47 = vpop.f32.mrb[8].mxu0  ;;  %v753_v49 = vpop.f32.mrb[8].mxu1 }
 0x166   : > { %v760_v52 = vadd.f32 %v712_v47, %v579_v34  ;;  %v762_v53 = vadd.f32 %v753_v49, %v620_v35  ;;  %v714_v54 = vpop.f32.mrb[9].mxu0  ;;  %v755_v55 = vpop.f32.mrb[9].mxu1 }
 0x167   : > { %v761_v56 = vadd.f32 %v714_v54, %v581_v38  ;;  %v763_v57 = vadd.f32 %v755_v55, %v622_v39  ;;  %v716_v58 = vpop.f32.mrb[10].mxu0  ;;  %v757_v59 = vpop.f32.mrb[10].mxu1 }
 0x168   : > { %v766_v60 = vadd.f32 %v765_v48, %v760_v52  ;;  %v768_v61 = vadd.f32 %v765_v48, %v762_v53  ;;  %v717_v62 = vpop.f32.mrb[11].mxu0  ;;  %v758_v63 = vpop.f32.mrb[11].mxu1 }
 0x169   : > { %v767_v0 = vadd.f32 %v765_v48, %v761_v56  ;;  %v769_v2 = vadd.f32 %v765_v48, %v763_v57 }
 0x16b   : > { %v774_v3 = vcombine.low %v766_v60, %v767_v0  ;;  %v775_v4 = vcombine.low %v768_v61, %v769_v2 }
 0x16d   : > { %v782_v5 = vrot.slane %v774_v3, %v781_v1  ;;  %v789_v6 = vrot.slane %v775_v4, %v781_v1 }
 0x16f   : > { %v790_v7 = vcombine.low %v782_v5, %v789_v6 }
 0x171   : > { %v797_v8 = vrot.slane %v790_v7, %v781_v1 }
 0x173   : > { %803 = vst.msk [vmem:[%s374_s28] sm:$0xf] %vm801_vm2, %v797_v8 }
 0x174   : > { %1178 = shalt.err (!%p1175_p10)
}
 0x175   : > { %s1179_s20 = scalar_lea.hbm %s1521_s25, 64  ;;  %s1183_s10 = scalar_lea.hbm %s1572_s7, 128 }
 0x176   : > { %p1180_p7 = scmp.ne.s32.totalorder %s1521_s25, %s1179_s20  ;;  %p1184_p4 = scmp.lt.u32.totalorder %s1521_s25, %s1572_s7 }
 0x177   : > { %p1185_p1 = scmp.lt.u32.totalorder %s1183_s10, %s1179_s20  ;;  %p1187_p13 = scmp.lt.u32.totalorder %s1179_s20, %s1521_s25 }
 0x178   : > { %p1181_p11 = pnand %p1180_p7, %p1604_p5 }
 0x179   : > { %p1186_p0 = por %p1185_p1, %p1184_p4 }
 0x17a   : > { %p1182_p2 = pneg %p1181_p11 }
 0x17b   : > { %p1188_p6 = por %p1187_p13, %p1186_p0 }
 0x17d   : > { %p1189_p9 = pnand %p1188_p6, %p1182_p2 }
 0x17f   : > { %1192 = shalt.err (!%p1189_p9)
}
 0x180   : > { %990 = dma.vmem_to_hbm [thread:$0]  (%p1604_p5), %s1523_s24, 64, %s1521_s25, %s805_s23  }
 0x181 PF: > { %s1605_s22 = sld [smem:[#allocation17_spill]]  ;;  %s1606_s18 = sld [smem:[#allocation14_spill]] }
 0x182   : > { %s831_s16 = sand.u32 1, %s1223_s26  }
 0x183   : > { %s832_s8 = scalar_lea.sflag [#allocation5], %s831_s16 }
 0x187   : > { %p1607_p12 = scmp.ne.s32.totalorder %s1605_s22, 0  ;;  %p1608_p3 = scmp.ge.s32.totalorder %s1606_s18, 2 }
 0x189   : > { %p1003_p8 = pnand %p1608_p3, %p1607_p12 }
 0x18b   : > { %1218 = dma.done.wait (!%p1003_p8), %s832_s8, 64  }
 0x18c   : > { %1220 = vsyncadd (!%p1003_p8), %s832_s8, 4294967232  ;;  %s1609_s29 = sld [smem:[#allocation15_spill]]  ;;  %s1610_s11 = sld [smem:[#allocation13_spill]] }
 0x18d   : > { %s1611_s28 = sld [smem:[#allocation16_spill]]  ;;  %s1612_s26 = smov %s1227_s27 }
 0x192   : > { %p24_p10 = scmp.ge.s32.totalorder %s1609_s29, 4   ;;  %s1613_s27 = smov %s1610_s11 }
 0x194   :  { %26 = sbr.rel (!%p24_p10) target bundleno = 10 (0xa), region = 117 }
 0x19b   :  { %837 = vsyncpa [#allocation4], 1 }
 0x19c   :  { %839 = vsyncpa [#allocation4 + $0x1], 1 }
 0x19d   :  { %840 = vsyncpa [#allocation7], 1 }
 0x19e   :  { %842 = vsyncpa [#allocation7 + $0x1], 1 }
 0x19f   :  { %843 = vsyncpa [#allocation5], 1 }
 0x1a0   :  { %845 = vsyncpa [#allocation5 + $0x1], 1 }

</bundles_post_ra>
